<compile_context>
chip_gen: v7x
topology: tpu7x:2x2x1
jax: 0.10.0
libtpu: 0.0.40
codegen_flags: <defaults>
</compile_context>

<pallas_src>
import functools

import jax
import jax.numpy as jnp
import numpy as np
from jax.experimental import pallas as pl
from jax.experimental.pallas import tpu as pltpu

LEVELS = (1, 2, 4)
_LANE = 128
_MIB = 1024 * 1024


def _cdiv(a, b):
    return -(-a // b)


def _round_up(x, m):
    return _cdiv(x, m) * m


def _sublane_align(itemsize):
    return {4: 8, 2: 16, 1: 32}.get(itemsize, 8)


def _vmem_capacity_bytes():
    try:
        return int(pltpu.get_tpu_info().vmem_capacity_bytes)
    except Exception:
        return 64 * _MIB  # conservative fallback (v7x per-TensorCore VMEM)


def _pool_geometry(H, W, levels):
    """Window list reproducing F.avg_pool2d(kernel_size=stride=(H//l, W//l))."""
    windows = []
    for level in levels:
        ph, pw = H // level, W // level
        if ph == 0 or pw == 0:
            raise ValueError(
                f"Pool size too small for input size {H}x{W} at level {level}")
        out_h = (H - ph) // ph + 1
        out_w = (W - pw) // pw + 1
        for oh in range(out_h):
            for ow in range(out_w):
                windows.append((oh * ph, ow * pw, ph, pw))
    return windows


@functools.lru_cache(maxsize=None)
def _pool_constants(H, W, levels, K_pad, dtype_name):
    """Device-cached (0/1 indicator P (K_pad, L) in input dtype, f32 1/area scale).

    Keeping the scale in f32 (applied after f32 accumulation) preserves
    exactness even when P is stored in bf16.  lru_cache => one host->device
    upload per configuration instead of one per call.
    """
    windows = _pool_geometry(H, W, levels)
    L = len(windows)
    p = np.zeros((K_pad, L), dtype=np.float32)
    s = np.zeros((1, L), dtype=np.float32)
    for col, (r0, c0, ph, pw) in enumerate(windows):
        m = np.zeros((H, W), dtype=np.float32)
        m[r0:r0 + ph, c0:c0 + pw] = 1.0
        p[:H * W, col] = m.reshape(-1)
        s[0, col] = 1.0 / float(ph * pw)
    p_dev = jnp.asarray(p, dtype=jnp.dtype(dtype_name))  # 0/1: exact in bf16
    s_dev = jnp.asarray(s)                               # f32
    return p_dev, s_dev, L


def _spp_kernel_single(x_ref, p_ref, s_ref, o_ref, *, precision):
    """Degenerate reduction (K fits one tile): no accumulator round-trip."""
    acc = jnp.dot(x_ref[...], p_ref[...],
                  preferred_element_type=jnp.float32, precision=precision)
    o_ref[...] = (acc * s_ref[...]).astype(o_ref.dtype)


def _spp_kernel_multi(x_ref, p_ref, s_ref, o_ref, acc_ref, *,
                      tk, k_valid, p_resident, ragged_k, precision):
    """K-tiled reduction with f32 VMEM accumulator (init/finalize via pl.when)."""
    k = pl.program_id(1)

    @pl.when(k == 0)
    def _():
        acc_ref[...] = jnp.zeros_like(acc_ref)

    x = x_ref[...]
    if ragged_k:
        # Mask the undefined tail of the last (partial) K tile: P's zero rows
        # would not protect against garbage NaN/Inf (0 * inf = nan).
        col = jax.lax.broadcasted_iota(jnp.int32, x.shape, 1)
        x = jnp.where(col < (k_valid - k * tk), x, jnp.zeros_like(x))

    if p_resident:
        # P is fully VMEM-resident (constant index_map); slice the K chunk.
        p = p_ref[pl.ds(pl.multiple_of(k * tk, _LANE), tk), :]
    else:
        p = p_ref[...]

    acc_ref[...] += jnp.dot(x, p, preferred_element_type=jnp.float32,
                            precision=precision)

    @pl.when(k == pl.num_programs(1) - 1)
    def _():
        o_ref[...] = (acc_ref[...] * s_ref[...]).astype(o_ref.dtype)


@functools.lru_cache(maxsize=None)
def _build_spp_fn(B, C, H, W, dtype_name, levels):
    dtype = jnp.dtype(dtype_name)
    itemsize = dtype.itemsize
    M, K = B * C, H * W

    vmem_cap = _vmem_capacity_bytes()
    budget = max(16 * _MIB, min(vmem_cap // 2, 48 * _MIB))     # working-set target
    vmem_limit = max(32 * _MIB, min(3 * vmem_cap // 4, 96 * _MIB))

    # ---- K tiling: balanced tiles (no rounding cliff); x is never padded. ----
    TK_MAX = 2048
    k_tiles = _cdiv(K, TK_MAX)
    if k_tiles == 1:
        TK = K                               # full-extent block, no masking
    else:
        TK = _round_up(_cdiv(K, k_tiles), _LANE)
        k_tiles = _cdiv(K, TK)
    K_pad = k_tiles * TK                     # only P (tiny, host-built) is padded

    # ---- M tiling: per-generation cap, >=2 row tiles when there is work. ----
    row_align = _sublane_align(itemsize)
    tk_bytes = _round_up(TK, _LANE) * itemsize
    TM_MAX = 2048 if budget >= 40 * _MIB else 1024
    TM_MAX = max(row_align,
                 min(TM_MAX, ((budget * 2 // 3) // (2 * tk_bytes)) // row_align * row_align))
    m_tiles = _cdiv(M, TM_MAX)
    if m_tiles == 1 and M >= 512:
        m_tiles = 2                          # let megacore split the row axis
    if m_tiles == 1:
        TM = M                               # full-extent block, no row padding
    else:
        TM = _round_up(_cdiv(M, m_tiles), row_align)
        m_tiles = _cdiv(M, TM)

    p_dev, s_dev, L = _pool_constants(H, W, levels, K_pad, dtype.name)

    # Keep P fully resident in VMEM when its (lane-padded, double-buffered)
    # footprint is small; otherwise stream (TK, L) chunks (only L=21 lanes wide
    # in HBM, so re-streaming per row tile costs ~L/TM of the x traffic).
    p_resident = (k_tiles > 1 and
                  2 * K_pad * _round_up(L, _LANE) * itemsize <= budget // 4)

    precision = (jax.lax.Precision.HIGHEST if dtype == jnp.float32 else None)

    if k_tiles == 1:
        kernel = functools.partial(_spp_kernel_single, precision=precision)
        grid = (m_tiles,)
        in_specs = [
            pl.BlockSpec((TM, K), lambda i: (i, 0)),
            pl.BlockSpec((K_pad, L), lambda i: (0, 0)),
            pl.BlockSpec((1, L), lambda i: (0, 0)),
        ]
        out_specs = pl.BlockSpec((TM, L), lambda i: (i, 0))
        scratch_shapes = ()
        dim_sem = ("parallel",)
        p_reads = 1
    else:
        kernel = functools.partial(
            _spp_kernel_multi, tk=TK, k_valid=K, p_resident=p_resident,
            ragged_k=(K % TK != 0), precision=precision)
        grid = (m_tiles, k_tiles)
        if p_resident:
            p_spec = pl.BlockSpec((K_pad, L), lambda i, k: (0, 0))
            p_reads = 1
        else:
            p_spec = pl.BlockSpec((TK, L), lambda i, k: (k, 0))
            p_reads = m_tiles
        in_specs = [
            pl.BlockSpec((TM, TK), lambda i, k: (i, k)),
            p_spec,
            pl.BlockSpec((1, L), lambda i, k: (0, 0)),
        ]
        out_specs = pl.BlockSpec((TM, L), lambda i, k: (i, 0))
        scratch_shapes = (pltpu.VMEM((TM, L), jnp.float32),)
        dim_sem = ("parallel", "arbitrary")

    cost = pl.CostEstimate(
        flops=2 * (m_tiles * TM) * K_pad * L,
        transcendentals=0,
        bytes_accessed=(M * K * itemsize                # x streamed once
                        + K_pad * L * itemsize * p_reads
                        + L * 4
                        + M * L * itemsize))

    call = pl.pallas_call(
        kernel,
        out_shape=jax.ShapeDtypeStruct((M, L), dtype),
        grid_spec=pltpu.PrefetchScalarGridSpec(
            num_scalar_prefetch=0,
            grid=grid,
            in_specs=in_specs,
            out_specs=out_specs,
            scratch_shapes=scratch_shapes),
        compiler_params=pltpu.CompilerParams(
            dimension_semantics=dim_sem,
            vmem_limit_bytes=vmem_limit),
        cost_estimate=cost,
    )

    @jax.jit
    def run(x, p, s):
        return call(x.reshape(M, K), p, s).reshape(B, C, L)

    def fn(x):
        return run(x, p_dev, s_dev)

    return fn


def spatial_pyramid_pooling(x, levels=LEVELS):
    """x: (B, C, H, W) -> (B, C, sum(level windows)); dtype preserved."""
    B, C, H, W = x.shape
    return _build_spp_fn(B, C, H, W, jnp.dtype(x.dtype).name, tuple(levels))(x)


def spatial_pyramid_pooling_ref(x, levels=LEVELS):
    """Pure-JAX reference with F.avg_pool2d floor-window semantics."""
    B, C, H, W = x.shape
    outs = []
    for level in levels:
        ph, pw = H // level, W // level
        oh = (H - ph) // ph + 1
        ow = (W - pw) // pw + 1
        vals = []
        for i in range(oh):
            for j in range(ow):
                win = x[:, :, i * ph:i * ph + ph, j * pw:j * pw + pw]
                vals.append(jnp.mean(win.astype(jnp.float32), axis=(2, 3)))
        outs.append(jnp.stack(vals, axis=2).astype(x.dtype))
    return jnp.concatenate(outs, axis=2)


if __name__ == "__main__":
    key = jax.random.PRNGKey(0)

    # Small canonical shape (single-K-tile fast path).
    B, C, H, W = 2, 4, 16, 16
    x = jax.random.normal(key, (B, C, H, W), dtype=jnp.float32)
    out = jax.block_until_ready(spatial_pyramid_pooling(x))
    ref = spatial_pyramid_pooling_ref(x)
    assert out.shape == (B, C, sum(l * l for l in LEVELS)), out.shape
    np.testing.assert_allclose(np.asarray(out), np.asarray(ref),
                               rtol=1e-5, atol=1e-5)

    # Second shape exercising the K-tiled path: f32 accumulator, resident P,
    # ragged K-tail masking, and non-divisible (floor-window) pooling.
    B2, C2, H2, W2 = 2, 8, 50, 50
    x2 = jax.random.normal(jax.random.PRNGKey(1), (B2, C2, H2, W2),
                           dtype=jnp.float32)
    out2 = jax.block_until_ready(spatial_pyramid_pooling(x2))
    ref2 = spatial_pyramid_pooling_ref(x2)
    assert out2.shape == ref2.shape, (out2.shape, ref2.shape)
    np.testing.assert_allclose(np.asarray(out2), np.asarray(ref2),
                               rtol=1e-5, atol=1e-5)

    print("KERNEL_OK")
</pallas_src>

<mosaic_0001>
module attributes {stable_mosaic.version = 11 : i64} {
  func.func @_spp_kernel_single(%arg0: i32, %arg1: memref<8x256xf32, #tpu.memory_space<vmem>>, %arg2: memref<256x21xf32, #tpu.memory_space<vmem>>, %arg3: memref<1x21xf32, #tpu.memory_space<vmem>>, %arg4: memref<8x21xf32, #tpu.memory_space<vmem>>) attributes {dimension_semantics = [#tpu.dimension_semantics<parallel>], iteration_bounds = array<i64: 1>, scalar_prefetch = 0 : i64, scratch_operands = 0 : i64, tpu.core_type = #tpu.core_type<tc>, window_params = [{transform_indices = @transform_0, window_bounds = array<i64: 8, 256>}, {pipeline_mode = #tpu.pipeline_mode<synchronous>, transform_indices = @transform_1, window_bounds = array<i64: 256, 21>}, {pipeline_mode = #tpu.pipeline_mode<synchronous>, transform_indices = @transform_2, window_bounds = array<i64: 1, 21>}, {transform_indices = @transform_3, window_bounds = array<i64: 8, 21>}]} {
    %c0 = arith.constant 0 : index
    %c0_0 = arith.constant 0 : index
    %0 = vector.load %arg1[%c0, %c0_0] : memref<8x256xf32, #tpu.memory_space<vmem>>, vector<8x256xf32>
    %c0_1 = arith.constant 0 : index
    %c0_2 = arith.constant 0 : index
    %1 = vector.load %arg2[%c0_1, %c0_2] : memref<256x21xf32, #tpu.memory_space<vmem>>, vector<256x21xf32>
    %cst = arith.constant dense<0.000000e+00> : vector<8x21xf32>
    %2 = tpu.matmul %0, %1, %cst {dimension_numbers = #tpu.dot_dimension_numbers<[1], [0], [0], [1], [0, 0, 1, 1], [], []>, precision = #tpu.contract_precision<fp32>} : vector<8x256xf32>, vector<256x21xf32>, vector<8x21xf32> -> vector<8x21xf32>
    %c0_3 = arith.constant 0 : index
    %c0_4 = arith.constant 0 : index
    %3 = vector.load %arg3[%c0_3, %c0_4] : memref<1x21xf32, #tpu.memory_space<vmem>>, vector<1x21xf32>
    %4 = vector.broadcast %3 : vector<1x21xf32> to vector<8x21xf32>
    %5 = arith.mulf %2, %4 : vector<8x21xf32>
    %c0_5 = arith.constant 0 : index
    %c0_6 = arith.constant 0 : index
    %6 = vector.load %arg4[%c0_5, %c0_6] : memref<8x21xf32, #tpu.memory_space<vmem>>, vector<8x21xf32>
    tpu.vector_store %arg4[%c0_5, %c0_6], %5 {strides = array<i32>} : memref<8x21xf32, #tpu.memory_space<vmem>>, vector<8x21xf32>,
    return
  }
  func.func @transform_0(%arg0: i32) -> (i32, i32) {
    %c0_i32 = arith.constant 0 : i32
    %c0_i32_0 = arith.constant 0 : i32
    return %arg0, %c0_i32 : i32, i32
  }
  func.func @transform_1(%arg0: i32) -> (i32, i32) {
    %c0_i32 = arith.constant 0 : i32
    %c0_i32_0 = arith.constant 0 : i32
    %c0_i32_1 = arith.constant 0 : i32
    return %c0_i32, %c0_i32_0 : i32, i32
  }
  func.func @transform_2(%arg0: i32) -> (i32, i32) {
    %c0_i32 = arith.constant 0 : i32
    %c0_i32_0 = arith.constant 0 : i32
    %c0_i32_1 = arith.constant 0 : i32
    return %c0_i32, %c0_i32_0 : i32, i32
  }
  func.func @transform_3(%arg0: i32) -> (i32, i32) {
    %c0_i32 = arith.constant 0 : i32
    %c0_i32_0 = arith.constant 0 : i32
    return %arg0, %c0_i32 : i32, i32
  }
}

</mosaic_0001>

<bundles_post_ra>
// kernel: run.1
= control target key start
LH: loop header
LB: loop body
LE: loop exit
PB: predicated region body
PF: predicated region fallthrough
CT: control target
= control target key end

     0   :  { %s1899_s0 = inlined_call_operand.vmem [shape: f32[8,256], index: 0, kind: input, shape index: {}]   ;;  %s1900_s1 = inlined_call_operand.vmem [shape: f32[256,21], index: 1, kind: input, shape index: {}]   ;;  %s1901_s2 = inlined_call_operand.vmem [shape: f32[1,21], index: 2, kind: input, shape index: {}]   ;;  %s1902_s3 = inlined_call_operand.hbm [shape: f32[8,21], index: 3, kind: output, shape index: {}]  }
   0x1   :  { %v33_v0 = vld [vmem:[%s1900_s1 + $0x80] sm:$0xff]  ;;  %v34_v1 = vld [vmem:[%s1900_s1 + $0x88] sm:$0xff]  ;;  %v35_v7 = vld [vmem:[%s1900_s1 + $0x90] sm:$0xff] }
   0x2   :  { %v17_v2 = vld [vmem:[%s1900_s1] sm:$0xff]  ;;  %v98_v3 = vand.u32 4294901760, %v33_v0  ;;  %v101_v4 = vand.u32 4294901760, %v34_v1  ;;  %v18_v5 = vld [vmem:[%s1900_s1 + $0x8] sm:$0xff]  ;;  %v36_v8 = vld [vmem:[%s1900_s1 + $0x98] sm:$0xff]  ;;  %v104_v10 = vand.u32 4294901760, %v35_v7 }
   0x3   :  { %v50_v6 = vand.u32 4294901760, %v17_v2  ;;  %v53_v9 = vand.u32 4294901760, %v18_v5  ;;  %v107_v11 = vand.u32 4294901760, %v36_v8  ;;  %v19_v12 = vld [vmem:[%s1900_s1 + $0x10] sm:$0xff]  ;;  %v20_v13 = vld [vmem:[%s1900_s1 + $0x18] sm:$0xff]  ;;  %v37_v18 = vld [vmem:[%s1900_s1 + $0xa0] sm:$0xff] }
   0x4   :  { %v1408_v14 = vpack.c.bf16 %v101_v4, %v98_v3  ;;  %v56_v16 = vand.u32 4294901760, %v19_v12  ;;  %v59_v17 = vand.u32 4294901760, %v20_v13  ;;  %v38_v19 = vld [vmem:[%s1900_s1 + $0xa8] sm:$0xff]  ;;  %v21_v23 = vld [vmem:[%s1900_s1 + $0x20] sm:$0xff]  ;;  %v1431_v25 = vsub.f32 %v35_v7, %v104_v10  ;;  %v39_v37 = vld [vmem:[%s1900_s1 + $0xb0] sm:$0xff] }
   0x5   :  { %v1410_v15 = vsub.f32 %v17_v2, %v50_v6  ;;  %v1418_v20 = vpack.c.bf16 %v53_v9, %v50_v6  ;;  %v1420_v21 = vsub.f32 %v18_v5, %v53_v9  ;;  %v1422_v22 = vpack.c.bf16 %v107_v11, %v104_v10  ;;  %v22_v24 = vld [vmem:[%s1900_s1 + $0x28] sm:$0xff]  ;;  %v40_v42 = vld [vmem:[%s1900_s1 + $0xb8] sm:$0xff]  ;;  %v23_v55 = vld [vmem:[%s1900_s1 + $0x30] sm:$0xff] }
   0x6   :  { %1147 = vmatprep.subr.bf16.mxu0 %v1408_v14  ;;  %v1433_v26 = vsub.f32 %v36_v8, %v107_v11  ;;  %v1435_v27 = vpack.c.bf16 %v59_v17, %v56_v16  ;;  %v1437_v28 = vsub.f32 %v19_v12, %v56_v16  ;;  %v110_v29 = vand.u32 4294901760, %v37_v18  ;;  %v24_v56 = vld [vmem:[%s1900_s1 + $0x38] sm:$0xff] }
   0x7   :  { %1149 = vmatpush3.bf16.msra.mxu0 %v1418_v20  ;;  %v113_v30 = vand.u32 4294901760, %v38_v19  ;;  %v1440_v31 = vsub.f32 %v33_v0, %v98_v3  ;;  %v1442_v32 = vsub.f32 %v34_v1, %v101_v4  ;;  %v62_v33 = vand.u32 4294901760, %v21_v23 }
   0x8   :  { %1151 = vmatprep.subr.bf16.mxu0 %v1422_v22  ;;  %v65_v34 = vand.u32 4294901760, %v22_v24  ;;  %v1919_v35 = vand.u32 4294901760, %v1410_v15  ;;  %v1918_v36 = vand.u32 4294901760, %v1420_v21  ;;  %v1450_v38 = vsub.f32 %v20_v13, %v59_v17 }
   0x9   :  { %v1452_v39 = vpack.c.bf16 %v113_v30, %v110_v29  ;;  %v1454_v40 = vsub.f32 %v37_v18, %v110_v29  ;;  %v1924_v41 = vand.u32 4294901760, %v1440_v31  ;;  %v1460_v43 = vsub.f32 %v38_v19, %v113_v30 }
   0xa   :  { %v1921_v44 = vand.u32 4294901760, %v1442_v32  ;;  %v1463_v45 = vpack.c.bf16 %v65_v34, %v62_v33  ;;  %v1465_v46 = vsub.f32 %v21_v23, %v62_v33  ;;  %v165_v48 = vsub.f32 %v1410_v15, %v1919_v35 }
   0xb   :  { %1153 = vmatpush3.bf16.msra.mxu0 %v1435_v27  ;;  %v277_v47 = vsub.f32 %v1440_v31, %v1924_v41  ;;  %v172_v49 = vsub.f32 %v1420_v21, %v1918_v36  ;;  %v116_v50 = vand.u32 4294901760, %v39_v37  ;;  %v119_v52 = vand.u32 4294901760, %v40_v42 }
   0xc   :  { %1155 = vmatprep.subr.bf16.mxu0 %v1452_v39  ;;  %v284_v51 = vsub.f32 %v1442_v32, %v1921_v44  ;;  %v1916_v53 = vand.u32 4294901760, %v1431_v25  ;;  %v1915_v54 = vand.u32 4294901760, %v1433_v26  ;;  %v1489_v58 = vsub.f32 %v22_v24, %v65_v34 }
   0xd   :  { %v278_v57 = vand.u32 4294901760, %v277_v47  ;;  %v166_v59 = vand.u32 4294901760, %v165_v48  ;;  %v173_v60 = vand.u32 4294901760, %v172_v49 }
   0xe   :  { %8 = vsyncpa [#allocation3], 0  ;;  %v285_v61 = vand.u32 4294901760, %v284_v51  ;;  %v1491_v62 = vpack.c.bf16 %v119_v52, %v116_v50  ;;  %v1493_v63 = vsub.f32 %v39_v37, %v116_v50  ;;  %v291_v0 = vsub.f32 %v1431_v25, %v1916_v53  ;;  %v41_v5 = vld [vmem:[%s1900_s1 + $0xc0] sm:$0xff]  ;;  %v42_v6 = vld [vmem:[%s1900_s1 + $0xc8] sm:$0xff]  ;;  %s1363_s26 = smov [#allocation2]  }
   0xf   :  { %1157 = vmatpush3.bf16.msra.mxu0 %v1463_v45  ;;  %v1180_v1 = vpack.c.bf16 %v173_v60, %v166_v59  ;;  %v298_v2 = vsub.f32 %v1433_v26, %v1915_v54  ;;  %v68_v3 = vand.u32 4294901760, %v23_v55  ;;  %v71_v4 = vand.u32 4294901760, %v24_v56  ;;  %v25_v11 = vld [vmem:[%s1900_s1 + $0x40] sm:$0xff]  ;;  %v26_v29 = vld [vmem:[%s1900_s1 + $0x48] sm:$0xff]  ;;  %s927_s27 = sshll.u32 %s1363_s26, 4  ;;  %s928_s27 = int_to_ptr.vmem [resolvable:$true] %s927_s27 }
  0x10   :  { %v1178_v7 = vpack.c.bf16 %v285_v61, %v278_v57  ;;  %1159 = vmatprep.subr.bf16.mxu0 %v1491_v62  ;;  %v292_v8 = vand.u32 4294901760, %v291_v0  ;;  %v1914_v9 = vand.u32 4294901760, %v1437_v28  ;;  %v1911_v10 = vand.u32 4294901760, %v1450_v38  ;;  %v44_v57 = vld [vmem:[%s1900_s1 + $0xd8] sm:$0xff]  ;;  %s1339_s28 = scalar_lea.vmem %s928_s27, 128  ;;  %p1344_p1 = scmp.lt.s32.totalorder %s928_s27, %s928_s27 }
  0x11   :  { %v1514_v12 = vsub.f32 %v40_v42, %v119_v52  ;;  %v299_v13 = vand.u32 4294901760, %v298_v2  ;;  %v1516_v16 = vpack.c.bf16 %v71_v4, %v68_v3  ;;  %v1518_v17 = vsub.f32 %v23_v55, %v68_v3  ;;  %p1340_p0 = scmp.ne.s32.totalorder %s928_s27, %s1339_s28  ;;  %p1345_p2 = scmp.lt.s32.totalorder %s1339_s28, %s1339_s28 }
  0x12   :  { %1179 = vmatprep.subr.bf16.mxu1 %v1178_v7  ;;  %v179_v18 = vsub.f32 %v1437_v28, %v1914_v9  ;;  %v186_v19 = vsub.f32 %v1450_v38, %v1911_v10  ;;  %v122_v23 = vand.u32 4294901760, %v41_v5  ;;  %v125_v24 = vand.u32 4294901760, %v42_v6 }
  0x13   :  { %1181 = vmatpush3.bf16.msra.mxu1 %v1180_v1  ;;  %v1182_v30 = vpack.c.bf16 %v299_v13, %v292_v8  ;;  %1161 = vmatpush3.bf16.msra.mxu0 %v1516_v16  ;;  %v1909_v33 = vand.u32 4294901760, %v1454_v40  ;;  %v1908_v34 = vand.u32 4294901760, %v1460_v43  ;;  %v74_v37 = vand.u32 4294901760, %v25_v11  ;;  %v27_v1 = vld [vmem:[%s1900_s1 + $0x50] sm:$0xff]  ;;  %p1346_p3 = por %p1345_p2, %p1344_p1 }
  0x14   :  { %v1532_v42 = vsub.f32 %v24_v56, %v71_v4  ;;  %v180_v47 = vand.u32 4294901760, %v179_v18  ;;  %v187_v48 = vand.u32 4294901760, %v186_v19  ;;  %v1534_v49 = vpack.c.bf16 %v125_v24, %v122_v23  ;;  %v43_v56 = vld [vmem:[%s1900_s1 + $0xd0] sm:$0xff]  ;;  %v28_v18 = vld [vmem:[%s1900_s1 + $0x58] sm:$0xff] }
  0x15   :  { %1183 = vmatprep.subr.bf16.mxu1 %v1182_v30  ;;  %v1536_v50 = vsub.f32 %v41_v5, %v122_v23  ;;  %v305_v51 = vsub.f32 %v1454_v40, %v1909_v33  ;;  %v312_v52 = vsub.f32 %v1460_v43, %v1908_v34  ;;  %v77_v55 = vand.u32 4294901760, %v26_v29  ;;  %p1347_p4 = pnand %p1346_p3, %p1340_p0 }
  0x16   :  { %v1184_v59 = vpack.c.bf16 %v187_v48, %v180_v47  ;;  %1163 = vmatprep.subr.bf16.mxu0 %v1534_v49  ;;  %v1551_v60 = vsub.f32 %v42_v6, %v125_v24  ;;  %v1906_v61 = vand.u32 4294901760, %v1465_v46  ;;  %v1905_v0 = vand.u32 4294901760, %v1489_v58 }
  0x17   :  { %v306_v2 = vand.u32 4294901760, %v305_v51  ;;  %v313_v3 = vand.u32 4294901760, %v312_v52  ;;  %v1558_v4 = vpack.c.bf16 %v77_v55, %v74_v37  ;;  %v1560_v5 = vsub.f32 %v25_v11, %v74_v37 }
  0x18   :  { %1185 = vmatpush3.bf16.msra.mxu1 %v1184_v59  ;;  %v193_v6 = vsub.f32 %v1465_v46, %v1906_v61  ;;  %v200_v7 = vsub.f32 %v1489_v58, %v1905_v0  ;;  %v128_v8 = vand.u32 4294901760, %v43_v56  ;;  %v131_v13 = vand.u32 4294901760, %v44_v57 }
  0x19   :  { %v1186_v19 = vpack.c.bf16 %v313_v3, %v306_v2  ;;  %1165 = vmatpush3.bf16.msra.mxu0 %v1558_v4  ;;  %v1904_v11 = vand.u32 4294901760, %v1493_v63  ;;  %v1903_v23 = vand.u32 4294901760, %v1514_v12  ;;  %v80_v24 = vand.u32 4294901760, %v27_v1 }
  0x1a   :  { %v1574_v30 = vsub.f32 %v26_v29, %v77_v55  ;;  %v194_v37 = vand.u32 4294901760, %v193_v6  ;;  %v201_v47 = vand.u32 4294901760, %v200_v7  ;;  %v1576_v48 = vpack.c.bf16 %v131_v13, %v128_v8  ;;  %v45_v29 = vld [vmem:[%s1900_s1 + $0xe0] sm:$0xff]  ;;  %v46_v55 = vld [vmem:[%s1900_s1 + $0xe8] sm:$0xff] }
  0x1b   :  { %1187 = vmatprep.subr.bf16.mxu1 %v1186_v19  ;;  %v1578_v51 = vsub.f32 %v43_v56, %v128_v8  ;;  %v319_v52 = vsub.f32 %v1493_v63, %v1904_v11  ;;  %v326_v59 = vsub.f32 %v1514_v12, %v1903_v23  ;;  %v83_v2 = vand.u32 4294901760, %v28_v18  ;;  %v29_v8 = vld [vmem:[%s1900_s1 + $0x60] sm:$0xff] }
  0x1c   :  { %v1188_v3 = vpack.c.bf16 %v201_v47, %v194_v37  ;;  %1167 = vmatprep.subr.bf16.mxu0 %v1576_v48  ;;  %v1593_v56 = vsub.f32 %v44_v57, %v131_v13  ;;  %v1907_v6 = vand.u32 4294901760, %v1518_v17  ;;  %v1910_v7 = vand.u32 4294901760, %v1532_v42 }
  0x1d   :  { %v320_v19 = vand.u32 4294901760, %v319_v52  ;;  %v327_v23 = vand.u32 4294901760, %v326_v59  ;;  %v1600_v11 = vpack.c.bf16 %v83_v2, %v80_v24  ;;  %v1602_v0 = vsub.f32 %v27_v1, %v80_v24  ;;  %v30_v52 = vld [vmem:[%s1900_s1 + $0x68] sm:$0xff] }
  0x1e   :  { %1189 = vmatpush3.bf16.msra.mxu1 %v1188_v3  ;;  %v207_v57 = vsub.f32 %v1518_v17, %v1907_v6  ;;  %v214_v13 = vsub.f32 %v1532_v42, %v1910_v7  ;;  %v134_v37 = vand.u32 4294901760, %v45_v29  ;;  %v137_v47 = vand.u32 4294901760, %v46_v55 }
  0x1f   :  { %1948 = vst [vmem:[#allocation5_spill] sm:$0xff] %v1600_v11  ;;  %v1190_v59 = vpack.c.bf16 %v327_v23, %v320_v19  ;;  %1169 = vmatpush3.bf16.msra.mxu0 %v1600_v11  ;;  %v1913_v1 = vand.u32 4294901760, %v1536_v50  ;;  %v1912_v24 = vand.u32 4294901760, %v1551_v60  ;;  %v86_v3 = vand.u32 4294901760, %v29_v8 }
  0x20   :  { %v1616_v61 = vsub.f32 %v28_v18, %v83_v2  ;;  %v208_v6 = vand.u32 4294901760, %v207_v57  ;;  %v215_v34 = vand.u32 4294901760, %v214_v13  ;;  %v1618_v33 = vpack.c.bf16 %v137_v47, %v134_v37  ;;  %v47_v18 = vld [vmem:[%s1900_s1 + $0xf0] sm:$0xff]  ;;  %v48_v2 = vld [vmem:[%s1900_s1 + $0xf8] sm:$0xff] }
  0x21   :  { %1191 = vmatprep.subr.bf16.mxu1 %v1190_v59  ;;  %v1620_v7 = vsub.f32 %v45_v29, %v134_v37  ;;  %v333_v23 = vsub.f32 %v1536_v50, %v1913_v1  ;;  %v340_v19 = vsub.f32 %v1551_v60, %v1912_v24  ;;  %v89_v10 = vand.u32 4294901760, %v30_v52  ;;  %v31_v59 = vld [vmem:[%s1900_s1 + $0x70] sm:$0xff] }
  0x22   :  { %1949 = vst [vmem:[#allocation6_spill] sm:$0xff] %v1618_v33  ;;  %v1192_v57 = vpack.c.bf16 %v215_v34, %v208_v6  ;;  %1171 = vmatprep.subr.bf16.mxu0 %v1618_v33  ;;  %v1635_v29 = vsub.f32 %v46_v55, %v137_v47  ;;  %v1917_v13 = vand.u32 4294901760, %v1560_v5  ;;  %v1920_v37 = vand.u32 4294901760, %v1574_v30 }
  0x23   :  { %v334_v24 = vand.u32 4294901760, %v333_v23  ;;  %v341_v1 = vand.u32 4294901760, %v340_v19  ;;  %v1642_v9 = vpack.c.bf16 %v89_v10, %v86_v3  ;;  %v1644_v54 = vsub.f32 %v29_v8, %v86_v3  ;;  %v32_v23 = vld [vmem:[%s1900_s1 + $0x78] sm:$0xff] }
  0x24   :  { %1193 = vmatpush3.bf16.msra.mxu1 %v1192_v57  ;;  %v221_v34 = vsub.f32 %v1560_v5, %v1917_v13  ;;  %v228_v55 = vsub.f32 %v1574_v30, %v1920_v37  ;;  %v140_v6 = vand.u32 4294901760, %v47_v18  ;;  %v143_v47 = vand.u32 4294901760, %v48_v2 }
  0x25   :  { %1950 = vst [vmem:[#allocation7_spill] sm:$0xff] %v1642_v9  ;;  %v1194_v19 = vpack.c.bf16 %v341_v1, %v334_v24  ;;  %1173 = vmatpush3.bf16.msra.mxu0 %v1642_v9  ;;  %v1923_v8 = vand.u32 4294901760, %v1578_v51  ;;  %v1922_v3 = vand.u32 4294901760, %v1593_v56  ;;  %v92_v57 = vand.u32 4294901760, %v31_v59 }
  0x26   :  { %v1658_v53 = vsub.f32 %v30_v52, %v89_v10  ;;  %v222_v13 = vand.u32 4294901760, %v221_v34  ;;  %v229_v36 = vand.u32 4294901760, %v228_v55  ;;  %v1660_v35 = vpack.c.bf16 %v143_v47, %v140_v6  ;;  %v16_v10 = vld [vmem:[%s1899_s0 + $0x8] sm:$0xff] }
  0x27   :  { %1195 = vmatprep.subr.bf16.mxu1 %v1194_v19  ;;  %v1662_v37 = vsub.f32 %v47_v18, %v140_v6  ;;  %v347_v1 = vsub.f32 %v1578_v51, %v1923_v8  ;;  %v354_v24 = vsub.f32 %v1593_v56, %v1922_v3  ;;  %v95_v44 = vand.u32 4294901760, %v32_v23  ;;  %v15_v6 = vld [vmem:[%s1899_s0] sm:$0xff] }
  0x28   :  { %1951 = vst [vmem:[#allocation8_spill] sm:$0xff] %v1660_v35  ;;  %v1196_v52 = vpack.c.bf16 %v229_v36, %v222_v13  ;;  %1175 = vmatprep.subr.bf16.mxu0 %v1660_v35  ;;  %v1674_v34 = vsub.f32 %v48_v2, %v143_v47  ;;  %v1927_v18 = vand.u32 4294901760, %v1602_v0  ;;  %v1928_v55 = vand.u32 4294901760, %v1616_v61 }
  0x29   :  { %v348_v19 = vand.u32 4294901760, %v347_v1  ;;  %v355_v3 = vand.u32 4294901760, %v354_v24  ;;  %v1681_v8 = vpack.c.bf16 %v95_v44, %v92_v57  ;;  %v1683_v41 = vsub.f32 %v31_v59, %v92_v57 }
  0x2a   :  { %1197 = vmatpush3.bf16.msra.mxu1 %v1196_v52  ;;  %v235_v36 = vsub.f32 %v1602_v0, %v1927_v18  ;;  %v242_v2 = vsub.f32 %v1616_v61, %v1928_v55  ;;  %v1691_v13 = vand.u32 4294901760, %v16_v10  ;;  %v1931_v47 = vand.u32 4294901760, %v1620_v7 }
  0x2b   :  { %1952 = vst [vmem:[#allocation9_spill] sm:$0xff] %v1681_v8  ;;  %v1198_v35 = vpack.c.bf16 %v355_v3, %v348_v19  ;;  %1177 = vmatpush3.bf16.msra.mxu0 %v1681_v8  ;;  %v1937_v1 = vand.u32 4294901760, %v1635_v29  ;;  %v1210_v59 = vpack.c.bf16 %v1442_v32, %v1440_v31  ;;  %v1698_v57 = vand.u32 4294901760, %v15_v6 }
  0x2c   :  { %1953 = vst [vmem:[#allocation10_spill] sm:$0xff] %v1691_v13  ;;  %v236_v24 = vand.u32 4294901760, %v235_v36  ;;  %v243_v52 = vand.u32 4294901760, %v242_v2  ;;  %v1701_v18 = vsub.f32 %v16_v10, %v1691_v13  ;;  %v361_v55 = vsub.f32 %v1620_v7, %v1931_v47  ;;  %386 = vmatprep.mubr.f32.mxu1 %v1691_v13 }
  0x2d   :  { %1199 = vmatprep.subr.bf16.mxu1 %v1198_v35  ;;  %v368_v3 = vsub.f32 %v1635_v29, %v1937_v1  ;;  %1211 = vmatprep.subr.bf16.mxu0 %v1210_v59  ;;  %v1711_v19 = vsub.f32 %v15_v6, %v1698_v57  ;;  %v1936_v36 = vand.u32 4294901760, %v1644_v54  ;;  %v1938_v10 = vand.u32 4294901760, %v1658_v53 }
  0x2e   :  { %v1715_v2 = vsub.f32 %v32_v23, %v95_v44  ;;  %v1200_v8 = vpack.c.bf16 %v243_v52, %v236_v24  ;;  %v1939_v47 = vand.u32 4294901760, %v1701_v18  ;;  %v362_v9 = vand.u32 4294901760, %v361_v55 }
  0x2f   :  { %v369_v13 = vand.u32 4294901760, %v368_v3  ;;  %v153_v35 = vand.u32 4294901760, %v1711_v19  ;;  %v249_v59 = vsub.f32 %v1644_v54, %v1936_v36  ;;  %v256_v6 = vsub.f32 %v1658_v53, %v1938_v10 }
  0x30   :  { %1201 = vmatpush3.bf16.msra.mxu1 %v1200_v8  ;;  %v148_v44 = vsub.f32 %v1701_v18, %v1939_v47  ;;  %v1212_v23 = vpack.c.bf16 %v1420_v21, %v1410_v15  ;;  %v1944_v55 = vand.u32 4294901760, %v1662_v37  ;;  %v1947_v24 = vand.u32 4294901760, %v1674_v34 }
  0x31   :  { %v1202_v52 = vpack.c.bf16 %v369_v13, %v362_v9  ;;  %v154_v3 = vsub.f32 %v1711_v19, %v153_v35  ;;  %v250_v36 = vand.u32 4294901760, %v249_v59  ;;  %v257_v1 = vand.u32 4294901760, %v256_v6 }
  0x32   :  { %v149_v10 = vand.u32 4294901760, %v148_v44  ;;  %v375_v8 = vsub.f32 %v1662_v37, %v1944_v55  ;;  %v382_v47 = vsub.f32 %v1674_v34, %v1947_v24  ;;  %v1946_v33 = vand.u32 4294901760, %v1683_v41 }
  0x33   :  { %1203 = vmatprep.subr.bf16.mxu1 %v1202_v52  ;;  %v155_v11 = vand.u32 4294901760, %v154_v3  ;;  %v1204_v9 = vpack.c.bf16 %v257_v1, %v250_v36  ;;  %v1214_v13 = vpack.c.bf16 %v1433_v26, %v1431_v25  ;;  %v1945_v59 = vand.u32 4294901760, %v1715_v2 }
  0x34   :  { %150 = vmatprep.mubr.f32.mxu0 %v149_v10  ;;  %v376_v6 = vand.u32 4294901760, %v375_v8  ;;  %v383_v44 = vand.u32 4294901760, %v382_v47  ;;  %v263_v55 = vsub.f32 %v1683_v41, %v1946_v33  ;;  %v1216_v3 = vpack.c.bf16 %v1450_v38, %v1437_v28 }
  0x35   :  { %156 = vmatmul.mubr.f32.vlgmr.msra.gmra.mrb[0].mxu0 %v155_v11  ;;  %1205 = vmatpush3.bf16.msra.mxu1 %v1204_v9  ;;  %v270_v52 = vsub.f32 %v1715_v2, %v1945_v59  ;;  %v1218_v10 = vpack.c.bf16 %v1460_v43, %v1454_v40  ;;  %v1220_v11 = vpack.c.bf16 %v1489_v58, %v1465_v46  ;;  %v1955_v9 = vand.u32 4294901760, %v1442_v32 }
  0x36   :  { %1213 = vmatpush3.bf16.msra.mxu0 %v1212_v23  ;;  %v1206_v1 = vpack.c.bf16 %v383_v44, %v376_v6  ;;  %v264_v36 = vand.u32 4294901760, %v263_v55  ;;  %523 = vmatprep.mubr.f32.mxu0 %v1701_v18  ;;  %v1222_v8 = vpack.c.bf16 %v1514_v12, %v1493_v63  ;;  %v1954_v55 = vand.u32 4294901760, %v1440_v31 }
  0x37   :  { %1215 = vmatprep.subr.bf16.mxu0 %v1214_v13  ;;  %v271_v47 = vand.u32 4294901760, %v270_v52  ;;  %v1956_v44 = vand.u32 4294901760, %v1410_v15  ;;  %v1957_v13 = vand.u32 4294901760, %v1420_v21  ;;  %v1958_v59 = vand.u32 4294901760, %v1431_v25 }
  0x38   :  { %1207 = vmatprep.subr.bf16.mxu1 %v1206_v1  ;;  %v1274_v6 = vpack.c.bf16 %v1955_v9, %v1954_v55  ;;  %v1959_v1 = vand.u32 4294901760, %v1433_v26  ;;  %v1960_v24 = vand.u32 4294901760, %v1437_v28  ;;  %v1962_v31 = vand.u32 4294901760, %v1454_v40 }
  0x39   :  { %v1208_v23 = vpack.c.bf16 %v271_v47, %v264_v36  ;;  %v1276_v52 = vpack.c.bf16 %v1957_v13, %v1956_v44  ;;  %v1961_v36 = vand.u32 4294901760, %v1450_v38  ;;  %v1963_v32 = vand.u32 4294901760, %v1460_v43  ;;  %v1978_v13 = vld [vmem:[#allocation7_spill] sm:$0xff] }
  0x3a   :  { %v1278_v33 = vpack.c.bf16 %v1959_v1, %v1958_v59  ;;  %1217 = vmatpush3.bf16.msra.mxu0 %v1216_v3  ;;  %v1964_v15 = vand.u32 4294901760, %v1465_v46  ;;  %v1965_v21 = vand.u32 4294901760, %v1489_v58  ;;  %v1966_v25 = vand.u32 4294901760, %v1493_v63  ;;  %v1979_v1 = vld [vmem:[#allocation8_spill] sm:$0xff] }
  0x3b   :  { %v1280_v47 = vpack.c.bf16 %v1961_v36, %v1960_v24  ;;  %v1282_v55 = vpack.c.bf16 %v1963_v32, %v1962_v31  ;;  %v1967_v26 = vand.u32 4294901760, %v1514_v12  ;;  %1209 = vmatpush3.bf16.msra.mxu1 %v1208_v23  ;;  %1219 = vmatprep.subr.bf16.mxu0 %v1218_v10  ;;  %v1968_v28 = vand.u32 4294901760, %v1518_v17  ;;  %v1980_v36 = vld [vmem:[#allocation9_spill] sm:$0xff] }
  0x3c   :  { %v1284_v9 = vpack.c.bf16 %v1965_v21, %v1964_v15  ;;  %v1969_v38 = vand.u32 4294901760, %v1532_v42  ;;  %v1970_v43 = vand.u32 4294901760, %v1536_v50  ;;  %v1971_v24 = vand.u32 4294901760, %v1551_v60  ;;  %1243 = vmatprep.subr.bf16.mxu1 %v1408_v14 }
  0x3d   :  { %v1286_v59 = vpack.c.bf16 %v1967_v26, %v1966_v25  ;;  %v1972_v58 = vand.u32 4294901760, %v1560_v5  ;;  %v1973_v3 = vand.u32 4294901760, %v1574_v30  ;;  %v1224_v12 = vpack.c.bf16 %v1532_v42, %v1518_v17 }
  0x3e   :  { %v1288_v40 = vpack.c.bf16 %v1969_v38, %v1968_v28  ;;  %v1290_v46 = vpack.c.bf16 %v1971_v24, %v1970_v43  ;;  %388 = vmatmul.mubr.f32.vlgmr.msra.gmra.mrb[0].mxu1 %v1698_v57  ;;  %1221 = vmatpush3.bf16.msra.mxu0 %v1220_v11  ;;  %v1226_v10 = vpack.c.bf16 %v1551_v60, %v1536_v50  ;;  %v1974_v23 = vand.u32 4294901760, %v1701_v18  ;;  %v1975_v18 = vld [vmem:[#allocation5_spill] sm:$0xff]  ;;  %v1976_v11 = vld [vmem:[#allocation6_spill] sm:$0xff]  ;;  %v935_v38 = vld [vmem:[%s1901_s2] ss:$0 sm:$0xff] }
  0x3f   :  { %v1292_v63 = vpack.c.bf16 %v1973_v3, %v1972_v58  ;;  %1245 = vmatpush3.bf16.msra.mxu1 %v1418_v20  ;;  %1223 = vmatprep.subr.bf16.mxu0 %v1222_v8  ;;  %v1228_v44 = vpack.c.bf16 %v1574_v30, %v1560_v5  ;;  %v1230_v17 = vpack.c.bf16 %v1593_v56, %v1578_v51  ;;  %v1977_v8 = vld [vmem:[#allocation10_spill] sm:$0xff]  ;;  %vm919_vm0 = vcmask 171008  }
  0x40   :  { %1247 = vmatprep.subr.bf16.mxu1 %v1422_v22  ;;  %630 = vmatprep.mubr.f32.mxu1 %v1974_v23  ;;  %v1232_v42 = vpack.c.bf16 %v1616_v61, %v1602_v0  ;;  %v1234_v50 = vpack.c.bf16 %v1635_v29, %v1620_v7  ;;  %v1236_v60 = vpack.c.bf16 %v1658_v53, %v1644_v54 }
  0x41   :  { %v1238_v5 = vpack.c.bf16 %v1674_v34, %v1662_v37  ;;  %v1240_v30 = vpack.c.bf16 %v1715_v2, %v1683_v41 }
  0x42   :  { %1225 = vmatpush3.bf16.msra.mxu0 %v1224_v12 }
  0x43   :  { %1249 = vmatpush3.bf16.msra.mxu1 %v1435_v27  ;;  %1227 = vmatprep.subr.bf16.mxu0 %v1226_v10 }
  0x44   :  { %1251 = vmatprep.subr.bf16.mxu1 %v1452_v39 }
  0x46   :  { %1229 = vmatpush3.bf16.msra.mxu0 %v1228_v44 }
  0x47   :  { %1253 = vmatpush3.bf16.msra.mxu1 %v1463_v45  ;;  %1231 = vmatprep.subr.bf16.mxu0 %v1230_v17 }
  0x48   :  { %1255 = vmatprep.subr.bf16.mxu1 %v1491_v62 }
  0x4a   :  { %1233 = vmatpush3.bf16.msra.mxu0 %v1232_v42 }
  0x4b   :  { %1257 = vmatpush3.bf16.msra.mxu1 %v1516_v16  ;;  %1235 = vmatprep.subr.bf16.mxu0 %v1234_v50 }
  0x4c   :  { %1259 = vmatprep.subr.bf16.mxu1 %v1534_v49 }
  0x4e   :  { %1237 = vmatpush3.bf16.msra.mxu0 %v1236_v60 }
  0x4f   :  { %1261 = vmatpush3.bf16.msra.mxu1 %v1558_v4  ;;  %1239 = vmatprep.subr.bf16.mxu0 %v1238_v5 }
  0x50   :  { %1263 = vmatprep.subr.bf16.mxu1 %v1576_v48 }
  0x52   :  { %1241 = vmatpush3.bf16.msra.mxu0 %v1240_v30 }
  0x53   :  { %1265 = vmatpush3.bf16.msra.mxu1 %v1975_v18  ;;  %1275 = vmatprep.subr.bf16.mxu0 %v1274_v6  ;;  %v1982_v6 = vand.u32 4294901760, %v1593_v56 }
  0x54   :  { %1267 = vmatprep.subr.bf16.mxu1 %v1976_v11 }
  0x55   :  { %526 = vmatmul.mubr.f32.vlgmr.msra.gmra.mrb[2].mxu0 %v1711_v19  ;;  %v1983_v19 = vand.u32 4294901760, %v1602_v0 }
  0x56   :  { %1277 = vmatpush3.bf16.msra.mxu0 %v1276_v52  ;;  %800 = vmatprep.mubr.f32.mxu0 %v1977_v8 }
  0x57   :  { %1269 = vmatpush3.bf16.msra.mxu1 %v1978_v13  ;;  %1279 = vmatprep.subr.bf16.mxu0 %v1278_v33  ;;  %v1981_v33 = vand.u32 4294901760, %v1578_v51  ;;  %v1987_v51 = vand.u32 4294901760, %v1644_v54 }
  0x58   :  { %1271 = vmatprep.subr.bf16.mxu1 %v1979_v1 }
  0x5a   :  { %1281 = vmatpush3.bf16.msra.mxu0 %v1280_v47 }
  0x5b   :  { %1273 = vmatpush3.bf16.msra.mxu1 %v1980_v36  ;;  %1283 = vmatprep.subr.bf16.mxu0 %v1282_v55 }
  0x5c   :  { %1307 = vmatprep.subr.bf16.mxu1 %v1408_v14  ;;  %v1294_v14 = vpack.c.bf16 %v1982_v6, %v1981_v33 }
  0x5e   :  { %634 = vmatmul.mubr.f32.vlgmr.msra.gmra.mrb[2].mxu1 %v153_v35  ;;  %1285 = vmatpush3.bf16.msra.mxu0 %v1284_v9 }
  0x5f   :  { %1309 = vmatpush3.bf16.msra.mxu1 %v1418_v20  ;;  %1287 = vmatprep.subr.bf16.mxu0 %v1286_v59  ;;  %v1984_v20 = vand.u32 4294901760, %v1616_v61  ;;  %v1989_v61 = vand.u32 4294901760, %v1662_v37 }
  0x60   :  { %1311 = vmatprep.subr.bf16.mxu1 %v1422_v22  ;;  %904 = vmatprep.mubr.f32.mxu1 %v1977_v8  ;;  %v1985_v22 = vand.u32 4294901760, %v1620_v7  ;;  %v1991_v7 = vand.u32 4294901760, %v1683_v41 }
  0x61   :  { %v1296_v35 = vpack.c.bf16 %v1984_v20, %v1983_v19 }
  0x62   :  { %1289 = vmatpush3.bf16.msra.mxu0 %v1288_v40 }
  0x63   :  { %1313 = vmatpush3.bf16.msra.mxu1 %v1435_v27  ;;  %1291 = vmatprep.subr.bf16.mxu0 %v1290_v46  ;;  %v1986_v27 = vand.u32 4294901760, %v1635_v29 }
  0x64   :  { %1315 = vmatprep.subr.bf16.mxu1 %v1452_v39  ;;  %v1988_v39 = vand.u32 4294901760, %v1658_v53 }
  0x65   :  { %v1298_v52 = vpack.c.bf16 %v1986_v27, %v1985_v22 }
  0x66   :  { %1293 = vmatpush3.bf16.msra.mxu0 %v1292_v63  ;;  %v1300_v56 = vpack.c.bf16 %v1988_v39, %v1987_v51 }
  0x67   :  { %1317 = vmatpush3.bf16.msra.mxu1 %v1463_v45  ;;  %1295 = vmatprep.subr.bf16.mxu0 %v1294_v14  ;;  %v1990_v45 = vand.u32 4294901760, %v1674_v34 }
  0x68   :  { %1319 = vmatprep.subr.bf16.mxu1 %v1491_v62  ;;  %v1992_v62 = vand.u32 4294901760, %v1715_v2 }
  0x69   :  { %v1302_v0 = vpack.c.bf16 %v1990_v45, %v1989_v61 }
  0x6a   :  { %1297 = vmatpush3.bf16.msra.mxu0 %v1296_v35  ;;  %v1304_v29 = vpack.c.bf16 %v1992_v62, %v1991_v7 }
  0x6b   :  { %1321 = vmatpush3.bf16.msra.mxu1 %v1516_v16  ;;  %1299 = vmatprep.subr.bf16.mxu0 %v1298_v52 }
  0x6c   :  { %1323 = vmatprep.subr.bf16.mxu1 %v1534_v49 }
  0x6e   :  { %1301 = vmatpush3.bf16.msra.mxu0 %v1300_v56 }
  0x6f   :  { %1325 = vmatpush3.bf16.msra.mxu1 %v1558_v4  ;;  %1303 = vmatprep.subr.bf16.mxu0 %v1302_v0 }
  0x70   :  { %1327 = vmatprep.subr.bf16.mxu1 %v1576_v48 }
  0x72   :  { %1305 = vmatpush3.bf16.msra.mxu0 %v1304_v29 }
  0x73   :  { %1329 = vmatpush3.bf16.msra.mxu1 %v1975_v18 }
  0x74   :  { %1331 = vmatprep.subr.bf16.mxu1 %v1976_v11 }
  0x75   :  { %802 = vmatmul.mubr.f32.vlgmr.msra.gmra.mrb[4].mxu0 %v1698_v57 }
  0x77   :  { %1333 = vmatpush3.bf16.msra.mxu1 %v1978_v13 }
  0x78   :  { %1335 = vmatprep.subr.bf16.mxu1 %v1979_v1 }
  0x7b   :  { %1337 = vmatpush3.bf16.msra.mxu1 %v1980_v36 }
  0x7e   :  { %906 = vmatmul.mubr.f32.vlgmr.msra.gmra.mrb[4].mxu1 %v1698_v57 }
 0x108   :  { %v968_v41 = vpop.f32.mrb[0].mxu0 }
 0x109   :  { %v969_v53 = vpop.f32.mrb[1].mxu0 }
 0x10a   :  { %v970_v54 = vadd.f32 %v969_v53, %v968_v41 }
 0x111   :  { %v1003_v16 = vpop.f32.mrb[0].mxu1 }
 0x112   :  { %v1004_v49 = vpop.f32.mrb[1].mxu1 }
 0x113   :  { %v1005_v4 = vadd.f32 %v1004_v49, %v1003_v16 }
 0x115   :  { %v390_v48 = vadd.f32 %v1005_v4, %v970_v54 }
 0x128   :  { %v1038_v37 = vpop.f32.mrb[2].mxu0 }
 0x129   :  { %v1039_v34 = vpop.f32.mrb[3].mxu0 }
 0x12a   :  { %v1040_v2 = vadd.f32 %v1039_v34, %v1038_v37 }
 0x12c   :  { %v528_v47 = vadd.f32 %v1040_v2, %v390_v48 }
 0x131   :  { %v1073_v31 = vpop.f32.mrb[2].mxu1 }
 0x132   :  { %v1074_v32 = vpop.f32.mrb[3].mxu1 }
 0x133   :  { %v1075_v55 = vadd.f32 %v1074_v32, %v1073_v31 }
 0x135   :  { %v636_v15 = vadd.f32 %v1075_v55, %v528_v47 }
 0x148   :  { %v1108_v21 = vpop.f32.mrb[4].mxu0 }
 0x149   :  { %v1109_v9 = vpop.f32.mrb[5].mxu0 }
 0x14a   :  { %v1110_v25 = vadd.f32 %v1109_v9, %v1108_v21 }
 0x14c   :  { %v804_v26 = vadd.f32 %v1110_v25, %v636_v15 }
 0x151   :  { %v1143_v57 = vpop.f32.mrb[4].mxu1 }
 0x152   :  { %v1144_v59 = vpop.f32.mrb[5].mxu1 }
 0x153   :  { %v1145_v28 = vadd.f32 %v1144_v59, %v1143_v57 }
 0x155   :  { %v908_v40 = vadd.f32 %v1145_v28, %v804_v26 }
 0x157   :  { %v918_v43 = vmul.f32 %v935_v38, %v908_v40 }
 0x159   :  { %920 = vst.msk [vmem:[#allocation2] sm:$0xff] %vm919_vm0, %v918_v43 }
 0x15a   :  { %1350 = shalt.err (!%p1347_p4)
}
 0x15b   :  { %s1351_s4 = scalar_lea.hbm %s1902_s3, 128 }
 0x15c   :  { %p1352_p5 = scmp.ne.s32.totalorder %s1902_s3, %s1351_s4  ;;  %p1355_p6 = scmp.lt.u32.totalorder %s1351_s4, %s1902_s3 }
 0x15e   :  { %p1357_p7 = pnand %p1355_p6, %p1352_p5 }
 0x160   :  { %1360 = shalt.err (!%p1357_p7)
}
 0x161   :  { %930 = dma.vmem_to_hbm [thread:$0]  %s928_s27, 128, %s1902_s3, [#allocation3]  }
 0x162   :  { %1361 = dma.done.wait [#allocation3], 128  }
 0x163   :  { %1362 = vsyncadd [#allocation3], 4294967168 }
 0x164   :  { %934 = vsyncpa [#allocation3], 1 }

</bundles_post_ra>
